<compile_context>
chip_gen: v6e
topology: v6e:2x2x1
jax: 0.10.0
libtpu: 0.0.40
codegen_flags: <defaults>
</compile_context>

<pallas_src>
import functools

import jax
import jax.numpy as jnp
from jax.experimental import pallas as pl
from jax.experimental.pallas import tpu as pltpu

TILE_B = 8  # f32 sublane group; batch tile per grid step


def _orthogonal(key, shape, gain=1.0, dtype=jnp.float32):
    """Deterministic orthogonal init (matches nn.init.orthogonal_ semantics)."""
    rows, cols = shape
    n = max(rows, cols)
    a = jax.random.normal(key, (n, n), dtype=jnp.float32)
    q, r = jnp.linalg.qr(a)
    q = q * jnp.sign(jnp.diag(r))  # make init unique / uniform
    return (gain * q[:rows, :cols]).astype(dtype)


def mlp_base_kernel(x_ref, w1_ref, b1_ref, w2_ref, b2_ref, clw_ref, clb_ref,
                    out_ref, *, hidden_size):
    """Fused actor+critic forward on one (TILE_B, D) batch tile.

    w1: (D, 2H)  = [actor_w1 | critic_w1]
    w2: (2H, 2H) = blockdiag(actor_w2, critic_w2)
    clw: (1, 2H) = [zeros(H) | critic_lin_w]  (row vector for the VPU reduction)
    out: (TILE_B, 2H): cols [0, H) = hidden_actor, cols [H, 2H) = value (broadcast)
    """
    x = x_ref[...]

    # Layer 1: one lane-dense (TILE_B, 2H) MXU matmul covering both branches.
    h1 = jnp.tanh(
        jnp.dot(x, w1_ref[...], preferred_element_type=jnp.float32) + b1_ref[...])

    # Layer 2: block-diagonal weight keeps actor/critic independent; single tanh.
    h2 = jnp.tanh(
        jnp.dot(h1, w2_ref[...], preferred_element_type=jnp.float32) + b2_ref[...])

    # critic_linear as VPU multiply + lane reduction (clw is zero over the actor half).
    value = jnp.sum(h2 * clw_ref[...], axis=-1, keepdims=True) + clb_ref[0, 0]

    # Pack into one lane-dense output slab: actor hidden in the low H lanes, value
    # broadcast into the high H lanes (wrapper slices column H).
    col = jax.lax.broadcasted_iota(jnp.int32, h2.shape, 1)
    out_ref[...] = jnp.where(col < hidden_size, h2, value)


@functools.partial(jax.jit, static_argnames=("tile_b",))
def mlp_base_forward(inputs, rnn_hxs, masks, att_mask, fused, *, tile_b=TILE_B):
    """Wrapper: calls the fused Pallas kernel, returns the 5-tuple like MLPBase.forward."""
    B, D = inputs.shape
    H2 = fused["w1"].shape[1]  # 2 * hidden_size
    H = H2 // 2

    # Pad batch to a multiple of the tile (no-op when already aligned).
    pad = (-B) % tile_b
    x = jnp.pad(inputs, ((0, pad), (0, 0))) if pad else inputs
    Bp = B + pad
    grid = (pl.cdiv(Bp, tile_b),)

    out = pl.pallas_call(
        functools.partial(mlp_base_kernel, hidden_size=H),
        out_shape=jax.ShapeDtypeStruct((Bp, H2), jnp.float32),
        grid=grid,
        in_specs=[
            pl.BlockSpec((tile_b, D), lambda i: (i, 0)),   # x tile
            pl.BlockSpec((D, H2), lambda i: (0, 0)),       # fused W1 (resident)
            pl.BlockSpec((1, H2), lambda i: (0, 0)),       # fused b1
            pl.BlockSpec((H2, H2), lambda i: (0, 0)),      # block-diag W2 (resident)
            pl.BlockSpec((1, H2), lambda i: (0, 0)),       # fused b2
            pl.BlockSpec((1, H2), lambda i: (0, 0)),       # critic_linear row vector
            pl.BlockSpec((1, 1), lambda i: (0, 0)),        # critic_linear bias
        ],
        out_specs=pl.BlockSpec((tile_b, H2), lambda i: (i, 0)),
        compiler_params=pltpu.CompilerParams(
            dimension_semantics=("parallel",)),            # shard batch across TCs (v7x)
    )(x, fused["w1"], fused["b1"], fused["w2"], fused["b2"],
      fused["clw_vec"], fused["clb"])

    hidden_actor = out[:B, :H]
    value = out[:B, H:H + 1]

    # matches torch: (critic_linear(hidden_critic), hidden_actor, rnn_hxs, None, att_mask)
    return value, hidden_actor, rnn_hxs, None, att_mask


def make_params(key, num_inputs, hidden_size):
    """Deterministic parameter init mirroring MLPBase.__init__:
       orthogonal(gain=tanh gain=5/3) weights, zero biases. Stored (in, out)."""
    gain = 5.0 / 3.0  # nn.init.calculate_gain('tanh')
    keys = jax.random.split(key, 5)
    return {
        "actor_w1": _orthogonal(keys[0], (num_inputs, hidden_size), gain),
        "actor_b1": jnp.zeros((1, hidden_size), jnp.float32),
        "actor_w2": _orthogonal(keys[1], (hidden_size, hidden_size), gain),
        "actor_b2": jnp.zeros((1, hidden_size), jnp.float32),
        "critic_w1": _orthogonal(keys[2], (num_inputs, hidden_size), gain),
        "critic_b1": jnp.zeros((1, hidden_size), jnp.float32),
        "critic_w2": _orthogonal(keys[3], (hidden_size, hidden_size), gain),
        "critic_b2": jnp.zeros((1, hidden_size), jnp.float32),
        "critic_lin_w": _orthogonal(keys[4], (hidden_size, 1), gain),
        "critic_lin_b": jnp.zeros((1, 1), jnp.float32),
    }


def fuse_params(params):
    """One-time fusion of the per-branch weights into lane-dense kernel operands."""
    H = params["actor_w2"].shape[0]
    w1 = jnp.concatenate([params["actor_w1"], params["critic_w1"]], axis=1)   # (D, 2H)
    b1 = jnp.concatenate([params["actor_b1"], params["critic_b1"]], axis=1)   # (1, 2H)
    w2 = jnp.zeros((2 * H, 2 * H), jnp.float32)
    w2 = w2.at[:H, :H].set(params["actor_w2"])
    w2 = w2.at[H:, H:].set(params["critic_w2"])                               # (2H, 2H)
    b2 = jnp.concatenate([params["actor_b2"], params["critic_b2"]], axis=1)   # (1, 2H)
    clw_vec = jnp.concatenate(
        [jnp.zeros((1, H), jnp.float32), params["critic_lin_w"].reshape(1, H)],
        axis=1)                                                                # (1, 2H)
    clb = params["critic_lin_b"].reshape(1, 1)                                 # (1, 1)
    return {"w1": w1, "b1": b1, "w2": w2, "b2": b2, "clw_vec": clw_vec, "clb": clb}


def _reference_forward(inputs, params):
    ha = jnp.tanh(inputs @ params["actor_w1"] + params["actor_b1"])
    ha = jnp.tanh(ha @ params["actor_w2"] + params["actor_b2"])
    hc = jnp.tanh(inputs @ params["critic_w1"] + params["critic_b1"])
    hc = jnp.tanh(hc @ params["critic_w2"] + params["critic_b2"])
    return hc @ params["critic_lin_w"] + params["critic_lin_b"], ha


if __name__ == "__main__":
    B = 16           # batch (2 tiles of TILE_B=8 -> exercises the parallel grid)
    NUM_INPUTS = 32  # observation dim
    HIDDEN = 64      # module default hidden_size

    key = jax.random.PRNGKey(0)
    k_x, k_p = jax.random.split(key)

    inputs = jax.random.normal(k_x, (B, NUM_INPUTS), dtype=jnp.float32)
    rnn_hxs = jnp.zeros((B, 1), jnp.float32)   # recurrent_hidden_state_size == 1
    masks = jnp.ones((B, 1), jnp.float32)
    att_mask = jnp.ones((B, 1), jnp.float32)

    params = make_params(k_p, NUM_INPUTS, HIDDEN)
    fused = fuse_params(params)

    value, hidden_actor, out_hxs, _, out_att = mlp_base_forward(
        inputs, rnn_hxs, masks, att_mask, fused)
    jax.block_until_ready((value, hidden_actor, out_hxs, out_att))

    # sanity check against the (unfused) pure-JAX reference
    ref_value, ref_actor = _reference_forward(inputs, params)
    assert value.shape == (B, 1) and hidden_actor.shape == (B, HIDDEN)
    assert jnp.allclose(value, ref_value, atol=1e-5)
    assert jnp.allclose(hidden_actor, ref_actor, atol=1e-5)

    print("KERNEL_OK")
</pallas_src>

<mosaic_0001>
module attributes {stable_mosaic.version = 11 : i64} {
  func.func @mlp_base_kernel(%arg0: i32, %arg1: memref<8x32xf32, #tpu.memory_space<vmem>>, %arg2: memref<32x128xf32, #tpu.memory_space<vmem>>, %arg3: memref<1x128xf32, #tpu.memory_space<vmem>>, %arg4: memref<128x128xf32, #tpu.memory_space<vmem>>, %arg5: memref<1x128xf32, #tpu.memory_space<vmem>>, %arg6: memref<1x128xf32, #tpu.memory_space<vmem>>, %arg7: memref<1x1xf32, #tpu.memory_space<vmem>>, %arg8: memref<8x128xf32, #tpu.memory_space<vmem>>) attributes {dimension_semantics = [#tpu.dimension_semantics<parallel>], iteration_bounds = array<i64: 2>, scalar_prefetch = 0 : i64, scratch_operands = 0 : i64, tpu.core_type = #tpu.core_type<tc>, window_params = [{transform_indices = @transform_0, window_bounds = array<i64: 8, 32>}, {pipeline_mode = #tpu.pipeline_mode<synchronous>, transform_indices = @transform_1, window_bounds = array<i64: 32, 128>}, {pipeline_mode = #tpu.pipeline_mode<synchronous>, transform_indices = @transform_2, window_bounds = array<i64: 1, 128>}, {pipeline_mode = #tpu.pipeline_mode<synchronous>, transform_indices = @transform_3, window_bounds = array<i64: 128, 128>}, {pipeline_mode = #tpu.pipeline_mode<synchronous>, transform_indices = @transform_4, window_bounds = array<i64: 1, 128>}, {pipeline_mode = #tpu.pipeline_mode<synchronous>, transform_indices = @transform_5, window_bounds = array<i64: 1, 128>}, {pipeline_mode = #tpu.pipeline_mode<synchronous>, transform_indices = @transform_6, window_bounds = array<i64: 1, 1>}, {transform_indices = @transform_7, window_bounds = array<i64: 8, 128>}]} {
    %c0 = arith.constant 0 : index
    %c0_0 = arith.constant 0 : index
    %0 = vector.load %arg1[%c0, %c0_0] : memref<8x32xf32, #tpu.memory_space<vmem>>, vector<8x32xf32>
    %c0_1 = arith.constant 0 : index
    %c0_2 = arith.constant 0 : index
    %1 = vector.load %arg2[%c0_1, %c0_2] : memref<32x128xf32, #tpu.memory_space<vmem>>, vector<32x128xf32>
    %cst = arith.constant dense<0.000000e+00> : vector<8x128xf32>
    %2 = tpu.matmul %0, %1, %cst {dimension_numbers = #tpu.dot_dimension_numbers<[1], [0], [0], [1], [0, 0, 1, 1], [], []>} : vector<8x32xf32>, vector<32x128xf32>, vector<8x128xf32> -> vector<8x128xf32>
    %c0_3 = arith.constant 0 : index
    %c0_4 = arith.constant 0 : index
    %3 = vector.load %arg3[%c0_3, %c0_4] : memref<1x128xf32, #tpu.memory_space<vmem>>, vector<1x128xf32>
    %4 = vector.broadcast %3 : vector<1x128xf32> to vector<8x128xf32>
    %5 = arith.addf %2, %4 : vector<8x128xf32>
    %6 = math.tanh %5 : vector<8x128xf32>
    %c0_5 = arith.constant 0 : index
    %c0_6 = arith.constant 0 : index
    %7 = vector.load %arg4[%c0_5, %c0_6] : memref<128x128xf32, #tpu.memory_space<vmem>>, vector<128x128xf32>
    %cst_7 = arith.constant dense<0.000000e+00> : vector<8x128xf32>
    %8 = tpu.matmul %6, %7, %cst_7 {dimension_numbers = #tpu.dot_dimension_numbers<[1], [0], [0], [1], [0, 0, 1, 1], [], []>} : vector<8x128xf32>, vector<128x128xf32>, vector<8x128xf32> -> vector<8x128xf32>
    %c0_8 = arith.constant 0 : index
    %c0_9 = arith.constant 0 : index
    %9 = vector.load %arg5[%c0_8, %c0_9] : memref<1x128xf32, #tpu.memory_space<vmem>>, vector<1x128xf32>
    %10 = vector.broadcast %9 : vector<1x128xf32> to vector<8x128xf32>
    %11 = arith.addf %8, %10 : vector<8x128xf32>
    %12 = math.tanh %11 : vector<8x128xf32>
    %c0_10 = arith.constant 0 : index
    %c0_11 = arith.constant 0 : index
    %13 = vector.load %arg6[%c0_10, %c0_11] : memref<1x128xf32, #tpu.memory_space<vmem>>, vector<1x128xf32>
    %14 = vector.broadcast %13 : vector<1x128xf32> to vector<8x128xf32>
    %15 = arith.mulf %12, %14 : vector<8x128xf32>
    %cst_12 = arith.constant dense<0.000000e+00> : vector<8xf32>
    %16 = vector.multi_reduction <add>, %15, %cst_12 [1] : vector<8x128xf32> to vector<8xf32>
    %17 = vector.shape_cast %16 : vector<8xf32> to vector<8x1xf32>
    %c0_13 = arith.constant 0 : index
    %c0_14 = arith.constant 0 : index
    %18 = vector.load %arg7[%c0_13, %c0_14] : memref<1x1xf32, #tpu.memory_space<vmem>>, vector<1x1xf32>
    %19 = vector.extract %18[0, 0] : f32 from vector<1x1xf32>
    %20 = vector.broadcast %19 : f32 to vector<8x1xf32>
    %21 = arith.addf %17, %20 : vector<8x1xf32>
    %22 = tpu.iota {dimensions = array<i32: 1>} : vector<8x128xi32>
    %c64_i32 = arith.constant 64 : i32
    %23 = vector.broadcast %c64_i32 : i32 to vector<8x128xi32>
    %24 = arith.cmpi slt, %22, %23 : vector<8x128xi32>
    %25 = vector.shape_cast %21 : vector<8x1xf32> to vector<8x1xf32>
    %26 = vector.broadcast %25 : vector<8x1xf32> to vector<8x128xf32>
    %27 = arith.select %24, %12, %26 : vector<8x128xi1>, vector<8x128xf32>
    %c0_15 = arith.constant 0 : index
    %c0_16 = arith.constant 0 : index
    %28 = vector.load %arg8[%c0_15, %c0_16] : memref<8x128xf32, #tpu.memory_space<vmem>>, vector<8x128xf32>
    tpu.vector_store %arg8[%c0_15, %c0_16], %27 {strides = array<i32>} : memref<8x128xf32, #tpu.memory_space<vmem>>, vector<8x128xf32>,
    return
  }
  func.func @transform_0(%arg0: i32) -> (i32, i32) {
    %c0_i32 = arith.constant 0 : i32
    %c0_i32_0 = arith.constant 0 : i32
    return %arg0, %c0_i32 : i32, i32
  }
  func.func @transform_1(%arg0: i32) -> (i32, i32) {
    %c0_i32 = arith.constant 0 : i32
    %c0_i32_0 = arith.constant 0 : i32
    %c0_i32_1 = arith.constant 0 : i32
    return %c0_i32, %c0_i32_0 : i32, i32
  }
  func.func @transform_2(%arg0: i32) -> (i32, i32) {
    %c0_i32 = arith.constant 0 : i32
    %c0_i32_0 = arith.constant 0 : i32
    %c0_i32_1 = arith.constant 0 : i32
    return %c0_i32, %c0_i32_0 : i32, i32
  }
  func.func @transform_3(%arg0: i32) -> (i32, i32) {
    %c0_i32 = arith.constant 0 : i32
    %c0_i32_0 = arith.constant 0 : i32
    %c0_i32_1 = arith.constant 0 : i32
    return %c0_i32, %c0_i32_0 : i32, i32
  }
  func.func @transform_4(%arg0: i32) -> (i32, i32) {
    %c0_i32 = arith.constant 0 : i32
    %c0_i32_0 = arith.constant 0 : i32
    %c0_i32_1 = arith.constant 0 : i32
    return %c0_i32, %c0_i32_0 : i32, i32
  }
  func.func @transform_5(%arg0: i32) -> (i32, i32) {
    %c0_i32 = arith.constant 0 : i32
    %c0_i32_0 = arith.constant 0 : i32
    %c0_i32_1 = arith.constant 0 : i32
    return %c0_i32, %c0_i32_0 : i32, i32
  }
  func.func @transform_6(%arg0: i32) -> (i32, i32) {
    %c0_i32 = arith.constant 0 : i32
    %c0_i32_0 = arith.constant 0 : i32
    %c0_i32_1 = arith.constant 0 : i32
    return %c0_i32, %c0_i32_0 : i32, i32
  }
  func.func @transform_7(%arg0: i32) -> (i32, i32) {
    %c0_i32 = arith.constant 0 : i32
    %c0_i32_0 = arith.constant 0 : i32
    return %arg0, %c0_i32 : i32, i32
  }
}

</mosaic_0001>

<bundles_post_ra>
// kernel: mlp_base_forward.1
= control target key start
LH: loop header
LB: loop body
LE: loop exit
PB: predicated region body
PF: predicated region fallthrough
CT: control target
= control target key end

     0   :  { %s1094_s0 = inlined_call_operand.hbm [shape: f32[16,32], index: 0, kind: input, shape index: {}]   ;;  %s1095_s1 = inlined_call_operand.hbm [shape: f32[32,128], index: 1, kind: input, shape index: {}]   ;;  %s1096_s2 = inlined_call_operand.vmem [shape: f32[1,128], index: 2, kind: input, shape index: {}]   ;;  %s1097_s3 = inlined_call_operand.hbm [shape: f32[128,128], index: 3, kind: input, shape index: {}]   ;;  %s1098_s4 = inlined_call_operand.vmem [shape: f32[1,128], index: 4, kind: input, shape index: {}]   ;;  %s1099_s5 = inlined_call_operand.vmem [shape: f32[1,128], index: 5, kind: input, shape index: {}]   ;;  %s1100_s6 = inlined_call_operand.<no memory space> [shape: f32[1,1], index: 6, kind: input, shape index: {}]   ;;  %s1101_s7 = inlined_call_operand.vmem [shape: f32[16,128], index: 7, kind: output, shape index: {}]  }
   0x1   :  { %v12_v0 = vstv %s1100_s6 }
   0x2   :  { %13 = vst [vmem:[#allocation2] sm:$0x1] %v12_v0 }
   0x3   :  { %14 = vsyncpa [#allocation4], 0 }
   0x4   :  { %16 = vsyncpa [#allocation4 + $0x1], 0 }
   0x5   :  { %17 = vsyncpa [#allocation6], 0  ;;  %s935_s26 = smov 0   ;;  %s937_s27 = smov 0  }
   0x6   :  { %s939_s28 = smov 0   ;;  %s941_s29 = smov 0  }
   0x7 LB: > { %s954_s6 = sadd.s32 4294967295, %s883_s29   ;;  %p43_p0 = scmp.ne.s32.totalorder %s875_s27, %s871_s26  ;;  %s883_s29 = sphi %s941_s29, %s1117_s29   ;;  %s879_s28 = sphi %s939_s28, %s1116_s28   ;;  %s875_s27 = sphi %s937_s27, %s1115_s27   ;;  %s871_s26 = sphi %s935_s26, %s1114_s26  }
   0x8   : > { %p1102_p1 = scmp.eq.s32.totalorder %s954_s6, 0  ;;  %p610_p2 = scmp.ge.s32.totalorder %s883_s29, 1 }
   0x9   : > { %p206_p3 = scmp.lt.s32.totalorder %s883_s29, 3  ;;  %s885_s9 = smov [#allocation5]  }
   0xa   : > { %p962_p4 = por %p1102_p1, %p43_p0  ;;  %s218_s10 = sshll.u32 %s885_s9, 4  ;;  %s219_s10 = int_to_ptr.vmem [resolvable:$true] %s218_s10 }
   0xb   : > { %p966_p5 = pnand %p610_p2, %p206_p3  ;;  %s886_s12 = smov [#allocation7]  }
   0xc   : > { %s1105_s30 = scalar_select %p962_p4, 1, 0 }
   0xd   : > { %s1106_s8 = scalar_select %p966_p5, 1, 0 }
   0xe   : > { %p707_p6 = pneg %p966_p5  ;;  %s234_s13 = sshll.u32 %s886_s12, 4  ;;  %s235_s13 = int_to_ptr.vmem [resolvable:$true] %s234_s13 }
   0xf   : > { %s776_s14 = scalar_lea.vmem %s219_s10, 512  ;;  %p784_p12 = scmp.lt.s32.totalorder %s219_s10, %s219_s10 }
  0x10   : > { %p974_p7 = pnand %p707_p6, %p1102_p1  ;;  %p777_p9 = scmp.ne.s32.totalorder %s219_s10, %s776_s14 }
  0x11   : > { %p785_p13 = scmp.lt.s32.totalorder %s776_s14, %s776_s14 }
  0x12   : > { %p767_p8 = pneg %p974_p7 }
  0x13   : > { %p786_p0 = por %p785_p13, %p784_p12 }
  0x14   : > { %p779_p10 = pnand %p777_p9, %p767_p8 }
  0x16   : > { %p780_p11 = pneg %p779_p10 }
  0x18   : > { %p787_p2 = pnand %p786_p0, %p780_p11 }
  0x1a   : > { %790 = shalt.err (!%p787_p2)
}
  0x1b   : > { %s887_s15 = smov 128   ;;  %s888_s16 = smov 8  }
  0x1c   : > { %710 = dma.hbm_to_vmem [thread:$0]  (!%p974_p7), %s1095_s1, 512, %s219_s10, [#allocation6], %s887_s15, %s887_s15, %s888_s16  }
  0x1d   : > { %s802_s19 = scalar_lea.vmem %s235_s13, 2048  ;;  %p810_p10 = scmp.lt.s32.totalorder %s235_s13, %s235_s13 }
  0x1e   : > { %p803_p3 = scmp.ne.s32.totalorder %s235_s13, %s802_s19  ;;  %p811_p1 = scmp.lt.s32.totalorder %s802_s19, %s802_s19 }
  0x20   : > { %p805_p6 = pnand %p803_p3, %p767_p8  ;;  %p812_p12 = por %p811_p1, %p810_p10 }
  0x22   : > { %p806_p9 = pneg %p805_p6 }
  0x24   : > { %p813_p11 = pnand %p812_p12, %p806_p9 }
  0x26   : > { %816 = shalt.err (!%p813_p11)
}
  0x27   : > { %713 = dma.hbm_to_vmem [thread:$0]  (!%p974_p7), %s1097_s3, 2048, %s235_s13, [#allocation6], %s887_s15, %s887_s15, %s888_s16  }
  0x28   : > { %s997_s22 = sadd.s32 1, %s883_s29   ;;  %s30_s23 = sadd.s32 1, %s879_s28 }
  0x29   : > { %s27_s24 = ssub.s32 %s883_s29, %s997_s22  ;;  %p37_p1 = scmp.ne.s32.totalorder %s879_s28, %s875_s27 }
  0x2a   : > { %p28_p8 = scmp.eq.s32.totalorder %s27_s24, 0  ;;  %p38_p13 = scmp.eq.s32.totalorder %s883_s29, 0 }
  0x2b   : > { %p720_p0 = scmp.lt.s32.totalorder %s883_s29, 2  ;;  %s257_s25 = sand.u32 1, %s879_s28  }
  0x2c   : > { %s1008_s26 = scalar_select %p28_p8, %s879_s28, %s30_s23  }
  0x2d   : > { %p39_p2 = por %p38_p13, %p37_p1  ;;  %s614_s9 = sshll.u32 %s257_s25, 3 }
  0x2e   : > { %s615_s10 = sshll.u32 %s883_s29, 7  ;;  %s261_s13 = scalar_lea.vmem [#allocation3], %s614_s9 }
  0x2f   : > { %s1014_s14 = scalar_lea.hbm %s1094_s0, %s615_s10  ;;  %s268_s15 = sshll.u32 %s261_s13, 4  ;;  %s269_s15 = int_to_ptr.vmem [resolvable:$true] %s268_s15 }
  0x30   : > { %p1016_p7 = pnand %p720_p0, %p39_p2  ;;  %s258_s17 = scalar_lea.sflag [#allocation4], %s257_s25 }
  0x31   : > { %s817_s18 = scalar_lea.hbm %s1014_s14, 128  ;;  %s822_s20 = scalar_lea.hbm %s1094_s0, 256 }
  0x32   : > { %p818_p3 = scmp.ne.s32.totalorder %s1014_s14, %s817_s18  ;;  %p819_p6 = pneg %p1016_p7 }
  0x33   : > { %p823_p12 = scmp.lt.s32.totalorder %s1014_s14, %s1094_s0  ;;  %p824_p11 = scmp.lt.s32.totalorder %s822_s20, %s817_s18 }
  0x34   : > { %p820_p9 = pnand %p819_p6, %p818_p3 }
  0x35   : > { %p825_p1 = por %p824_p11, %p823_p12 }
  0x36   : > { %p821_p10 = pneg %p820_p9 }
  0x38   : > { %p826_p8 = pnand %p825_p1, %p821_p10 }
  0x3a   : > { %829 = shalt.err (!%p826_p8)
}
  0x3b   : > { %s830_s24 = scalar_lea.vmem %s269_s15, 128  ;;  %s889_s25 = smov [#allocation3]  }
  0x3c   : > { %p831_p13 = scmp.ne.s32.totalorder %s269_s15, %s830_s24  ;;  %s835_s9 = sshll.u32 %s889_s25, 4  ;;  %s836_s9 = int_to_ptr.vmem [resolvable:$false] %s835_s9 }
  0x3d   : > { %s837_s10 = scalar_lea.vmem %s836_s9, 256  ;;  %p838_p3 = scmp.lt.s32.totalorder %s269_s15, %s836_s9 }
  0x3e   : > { %p833_p0 = pnand %p831_p13, %p819_p6  ;;  %p839_p9 = scmp.lt.s32.totalorder %s837_s10, %s830_s24 }
  0x40   : > { %p834_p2 = pneg %p833_p0  ;;  %p840_p4 = por %p839_p9, %p838_p3 }
  0x42   : > { %p841_p5 = pnand %p840_p4, %p834_p2 }
  0x44   : > { %844 = shalt.err (!%p841_p5)
}
  0x45   : > { %717 = dma.hbm_to_vmem [thread:$0]  (!%p1016_p7), %s1014_s14, 128, %s269_s15, %s258_s17  }
  0x46   : > { %p1109_p10 = scmp.ne.s32.totalorder %s1106_s8, 0 }
  0x47   : > { %s279_s11 = sand.u32 (!%p1109_p10), 1, %s875_s27   ;;  %p1110_p6 = scmp.ne.s32.totalorder (!%p1109_p10), %s1105_s30, 0 }
  0x48   : > { %277 = sbr.rel (%p1109_p10) target bundleno = 653 (0x28d), region = 48  ;;  %s617_s12 = sshll.u32 (!%p1109_p10), %s279_s11, 3 }
  0x49   : > { %s280_s13 = scalar_lea.sflag (!%p1109_p10), [#allocation4], %s279_s11  ;;  %s283_s18 = scalar_lea.vmem (!%p1109_p10), [#allocation3], %s617_s12 }
  0x4d   : > { %862 = dma.done.wait (%p1110_p6), %s280_s13, 128  }
  0x4e   : > { %864 = vsyncadd (%p1110_p6), %s280_s13, 4294967168  ;;  %p1111_p4 = scmp.eq.s32.totalorder %s954_s6, 0 }
  0x50   : > { %866 = dma.done.wait (%p1111_p4), [#allocation6], 2560   ;;  %p1112_p5 = pmov %p1111_p4 }
  0x51   : > { %v890_v1 = vmov 0.0   ;;  %vm891_vm0 = vmmov 0   ;;  %v329_v2 = vld [vmem:[#allocation5 + $0x18] sm:$0xff]  ;;  %v328_v3 = vld [vmem:[#allocation5 + $0x10] sm:$0xff]  ;;  %v327_v5 = vld [vmem:[#allocation5 + $0x8] sm:$0xff]  ;;  %vm337_vm1 = vcmask 261120   ;;  %v520_v36 = vlaneseq }
  0x52   : > { %868 = vsyncadd (%p1112_p5), [#allocation6], 4294964736  ;;  %649 = vmatprep.subr.mxu0 %v890_v1  ;;  %657 = vmatprep.mubr.msk.f32.mxu0 %vm891_vm0, %v890_v1  ;;  %v427_v4 = vld [vmem:[#allocation7 + $0x78] sm:$0xff]  ;;  %v426_v6 = vld [vmem:[#allocation7 + $0x70] sm:$0xff]  ;;  %p321_p7 = scmp.lt.s32.totalorder %s954_s6, 1 }
  0x53   : > { %660 = vmatprep.subr.mxu1 %v890_v1  ;;  %692 = vmatprep.mubr.msk.f32.mxu1 %vm891_vm0, %v890_v1  ;;  %v425_v7 = vld [vmem:[#allocation7 + $0x68] sm:$0xff]  ;;  %v326_v8 = vld [vmem:[#allocation5] sm:$0xff]  ;;  %v325_v9 = vld [vmem:[%s283_s18] sm:$0xff]  ;;  %v521_v37 = vand.u32 127, %v520_v36 }
  0x54   : > { %650 = vmatpush3.msra.mxu0 %v329_v2  ;;  %661 = vmatpush3.msra.mxu1 %v427_v4  ;;  %v424_v10 = vld [vmem:[#allocation7 + $0x60] sm:$0xff]  ;;  %v423_v11 = vld [vmem:[#allocation7 + $0x58] sm:$0xff]  ;;  %v422_v12 = vld [vmem:[#allocation7 + $0x50] sm:$0xff]  ;;  %s1119_s6 = smov (!%p321_p7, %s954_s6), 1 }
  0x55   : > { %651 = vmatprep.subr.mxu0 %v890_v1  ;;  %662 = vmatprep.subr.mxu1 %v890_v1  ;;  %v421_v13 = vld [vmem:[#allocation7 + $0x48] sm:$0xff]  ;;  %v420_v14 = vld [vmem:[#allocation7 + $0x40] sm:$0xff]  ;;  %v419_v15 = vld [vmem:[#allocation7 + $0x38] sm:$0xff]  ;;  %s620_s19 = sshll.u32 %s1119_s6, 3  ;;  %vm522_vm2 = vcmp.lt.s32.totalorder %v521_v37, 64 }
  0x56   : > { %652 = vmatpush3.msra.mxu0 %v328_v3  ;;  %663 = vmatpush3.msra.mxu1 %v426_v6  ;;  %v418_v16 = vld [vmem:[#allocation7 + $0x30] sm:$0xff]  ;;  %v417_v17 = vld [vmem:[#allocation7 + $0x28] sm:$0xff]  ;;  %v416_v18 = vld [vmem:[#allocation7 + $0x20] sm:$0xff]  ;;  %s324_s23 = scalar_lea.vmem %s1101_s7, %s620_s19 }
  0x57   : > { %653 = vmatprep.subr.mxu0 %v890_v1  ;;  %664 = vmatprep.subr.mxu1 %v890_v1  ;;  %v415_v19 = vld [vmem:[#allocation7 + $0x18] sm:$0xff]  ;;  %v414_v20 = vld [vmem:[#allocation7 + $0x10] sm:$0xff]  ;;  %v413_v21 = vld [vmem:[#allocation7 + $0x8] sm:$0xff] }
  0x58   : > { %654 = vmatpush3.msra.mxu0 %v327_v5  ;;  %665 = vmatpush3.msra.mxu1 %v425_v7  ;;  %v412_v22 = vld [vmem:[#allocation7] sm:$0xff]  ;;  %v621_v23 = vld [vmem:[%s1096_s2] ss:$0 sm:$0xff] }
  0x59   : > { %655 = vmatprep.subr.mxu0 %v890_v1  ;;  %666 = vmatprep.subr.mxu1 %v890_v1  ;;  %v516_v28 = vld [vmem:[#allocation2] sm:$0x1] }
  0x5a   : > { %656 = vmatpush3.msra.mxu0 %v326_v8  ;;  %667 = vmatpush3.msra.mxu1 %v424_v10  ;;  %695 = vpush %v516_v28  ;;  %v623_v29 = vld [vmem:[%s1098_s4] ss:$0 sm:$0xff] }
  0x5b   : > { %658 = vmatmul.mubr.msk.f32.vlgmr.msra.gmra.mxu0 %vm337_vm1, %v325_v9  ;;  %668 = vmatprep.subr.mxu1 %v890_v1  ;;  %v624_v33 = vld [vmem:[%s1099_s5] ss:$0 sm:$0xff] }
  0x5c   : > { %669 = vmatpush3.msra.mxu1 %v423_v11 }
  0x5d   : > { %670 = vmatprep.subr.mxu1 %v890_v1 }
  0x5e   : > { %671 = vmatpush3.msra.mxu1 %v422_v12 }
  0x5f   : > { %672 = vmatprep.subr.mxu1 %v890_v1 }
  0x60   : > { %673 = vmatpush3.msra.mxu1 %v421_v13 }
  0x61   : > { %674 = vmatprep.subr.mxu1 %v890_v1 }
  0x62   : > { %675 = vmatpush3.msra.mxu1 %v420_v14 }
  0x63   : > { %676 = vmatprep.subr.mxu1 %v890_v1 }
  0x64   : > { %677 = vmatpush3.msra.mxu1 %v419_v15 }
  0x65   : > { %678 = vmatprep.subr.mxu1 %v890_v1 }
  0x66   : > { %679 = vmatpush3.msra.mxu1 %v418_v16 }
  0x67   : > { %680 = vmatprep.subr.mxu1 %v890_v1 }
  0x68   : > { %681 = vmatpush3.msra.mxu1 %v417_v17 }
  0x69   : > { %682 = vmatprep.subr.mxu1 %v890_v1 }
  0x6a   : > { %683 = vmatpush3.msra.mxu1 %v416_v18 }
  0x6b   : > { %684 = vmatprep.subr.mxu1 %v890_v1 }
  0x6c   : > { %685 = vmatpush3.msra.mxu1 %v415_v19 }
  0x6d   : > { %686 = vmatprep.subr.mxu1 %v890_v1 }
  0x6e   : > { %687 = vmatpush3.msra.mxu1 %v414_v20 }
  0x6f   : > { %688 = vmatprep.subr.mxu1 %v890_v1 }
  0x70   : > { %689 = vmatpush3.msra.mxu1 %v413_v21 }
  0x71   : > { %690 = vmatprep.subr.mxu1 %v890_v1 }
  0x72   : > { %691 = vmatpush3.msra.mxu1 %v412_v22 }
  0x8b   : > { %s696_s29 = spop %695 }
  0x8c   : > { %v518_v38 = vstv %s696_s29 }
 0x11b   : > { %v407_v24 = vpop.f32.mrf.mxu0 }
 0x11c   : > { %v408_v25 = vadd.f32 %v621_v23, %v407_v24 }
 0x11d   : > { %v659_v26 = vpop.f32.mrf.mxu0 }
 0x11e   : > { %761 = vtanh.f32 %v408_v25 }
 0x12b   : > { %v762_v27 = vpop.eup %761 }
 0x12c   : > { %693 = vmatmul.mubr.f32.vlgmr.msra.gmra.mxu1 %v762_v27 }
 0x1ec   : > { %v501_v30 = vpop.f32.mrf.mxu1 }
 0x1ed   : > { %v502_v31 = vadd.f32 %v623_v29, %v501_v30 }
 0x1ee   : > { %v694_v32 = vpop.f32.mrf.mxu1 }
 0x1ef   : > { %763 = vtanh.f32 %v502_v31 }
 0x1fc   : > { %v764_v34 = vpop.eup %763 }
 0x1fd   : > { %v513_v35 = vmul.f32 %v764_v34, %v624_v33 }
 0x1ff   : > { %514 = vadd.xlane.f32.xlu0 %v513_v35 }
 0x288   : > { %v515_v39 = vpop.xlane.xlu0 %514 }
 0x289   : > { %v519_v40 = vadd.f32 %v518_v38, %v515_v39 }
 0x28b   : > { %v523_v41 = vsel %vm522_vm2, %v764_v34, %v519_v40 }
 0x28c   : > { %524 = vst [vmem:[%s324_s23] sm:$0xff] %v523_v41 }
 0x28d PF: > { %s1113_s24 = smov %s1008_s26  ;;  %p20_p12 = scmp.ge.s32.totalorder %s997_s22, 4  }
 0x28e   : > { %s1114_s26 = smov %s875_s27  ;;  %s1115_s27 = smov %s879_s28 }
 0x28f   : > { %s1116_s28 = smov %s1113_s24  ;;  %s1117_s29 = smov %s997_s22 }
 0x290   :  { %22 = sbr.rel (!%p20_p12) target bundleno = 7 (0x7), region = 96 }
 0x295   :  { %544 = vsyncpa [#allocation4], 1 }
 0x296   :  { %546 = vsyncpa [#allocation4 + $0x1], 1 }
 0x297   :  { %547 = vsyncpa [#allocation6], 1 }

</bundles_post_ra>
